<compile_context>
chip_gen: v7x
topology: tpu7x:2x2x1
jax: 0.10.0
libtpu: 0.0.40
codegen_flags: <defaults>
</compile_context>

<pallas_src>
import jax
import jax.numpy as jnp
from jax.experimental import pallas as pl
from jax.experimental.pallas import tpu as pltpu

VOCAB = 26
EPS = 1e-5


def protein_cnn_kernel(tok_ref, w1_ref, w2_ref, w3_ref, prm_ref, out_ref):
    B, L = tok_ref.shape
    CP = w1_ref.shape[1]                 # padded channel width (multiple of 128)
    K1 = w1_ref.shape[0] // CP
    K2 = w2_ref.shape[0] // CP
    K3 = w3_ref.shape[0] // CP

    prm = prm_ref[...]                   # (9, CP) f32: [bias, gamma, beta] x 3 layers

    def im2col(x, K):
        # x: (B, Lin, CP) channels-last -> (B*Lout, K*CP); lane-aligned concat
        # (offsets are multiples of 128), so one MXU contraction per layer.
        b, lin, c = x.shape
        lout = lin - K + 1
        cols = jnp.concatenate([x[:, k:k + lout, :] for k in range(K)], axis=-1)
        return cols.reshape(b * lout, K * c), lout

    def relu_bn(h, li):
        # h: (N, CP) f32 conv output (pre-bias). Bias + ReLU, then train-mode
        # BatchNorm folded into a single FMA; stats in one pass (sum, sumsq).
        bias = prm[3 * li + 0:3 * li + 1, :]
        gamma = prm[3 * li + 1:3 * li + 2, :]
        beta = prm[3 * li + 2:3 * li + 3, :]
        h = jnp.maximum(h + bias, 0.0)
        inv_n = 1.0 / h.shape[0]
        mean = jnp.sum(h, axis=0, keepdims=True) * inv_n
        ex2 = jnp.sum(h * h, axis=0, keepdims=True) * inv_n
        var = ex2 - mean * mean                      # biased variance (BN train mode)
        scale = gamma * jax.lax.rsqrt(var + EPS)
        shift = beta - mean * scale
        return h * scale + shift                     # zero-padded channels stay 0

    # --- embedding as a bf16 one-hot, folded into conv1 (single MXU pass) ---
    tok = tok_ref[...]                                             # (B, L) int32
    iota = jax.lax.broadcasted_iota(jnp.int32, (B, L, CP), 2)
    onehot = (tok[:, :, None] == iota).astype(jnp.bfloat16)        # (B, L, CP)

    cols1, l1 = im2col(onehot, K1)
    x1 = relu_bn(jnp.dot(cols1, w1_ref[...],
                         preferred_element_type=jnp.float32), 0)
    x1 = x1.reshape(B, l1, CP).astype(jnp.bfloat16)

    cols2, l2 = im2col(x1, K2)
    x2 = relu_bn(jnp.dot(cols2, w2_ref[...],
                         preferred_element_type=jnp.float32), 1)
    x2 = x2.reshape(B, l2, CP).astype(jnp.bfloat16)

    cols3, l3 = im2col(x2, K3)
    x3 = relu_bn(jnp.dot(cols3, w3_ref[...],
                         preferred_element_type=jnp.float32), 2)

    out_ref[...] = x3.reshape(B, l3, CP)             # lane-dense (128-wide) stores


def protein_cnn_forward(tokens, emb, p1, p2, p3):
    """tokens: (B, L) int32. Returns (B, L3, F3) matching the PyTorch forward."""
    B, L = tokens.shape
    w1, b1, g1, bt1 = p1
    w2, b2, g2, bt2 = p2
    w3, b3, g3, bt3 = p3
    K1, E, C1 = w1.shape
    K2, _, C2 = w2.shape
    K3, _, C3 = w3.shape
    V = emb.shape[0]
    L3 = L - (K1 - 1) - (K2 - 1) - (K3 - 1)

    # All channel-like dims are zero-padded to a 128-lane multiple so every
    # in-kernel concat / matmul / store is tile-aligned.
    CP = ((max(V, C1, C2, C3) + 127) // 128) * 128

    def pad_dim(x, axis, target):
        widths = [(0, 0)] * x.ndim
        widths[axis] = (0, target - x.shape[axis])
        return jnp.pad(x, widths)

    # Fold the embedding into conv1: per-tap tables emb @ w1[k]  ->  (K1*CP, CP).
    t1 = jnp.einsum('ve,kec->kvc', emb, w1)                        # (K1, V, C1)
    w1f = pad_dim(pad_dim(t1, 1, CP), 2, CP).reshape(K1 * CP, CP).astype(jnp.bfloat16)

    def conv_w(w):                                                 # (K, cin, cout) -> (K*CP, CP)
        return pad_dim(pad_dim(w, 1, CP), 2, CP).reshape(-1, CP).astype(jnp.bfloat16)

    w2f = conv_w(w2)
    w3f = conv_w(w3)

    # Pack the 9 tiny per-channel vectors into one (9, CP) f32 array.
    def row(v):
        v = v.reshape(-1)
        return jnp.pad(v, (0, CP - v.shape[0]))

    prm = jnp.stack([row(v) for v in (b1, g1, bt1,
                                      b2, g2, bt2,
                                      b3, g3, bt3)]).astype(jnp.float32)

    vmem = pl.BlockSpec(memory_space=pltpu.MemorySpace.VMEM)
    out_p = pl.pallas_call(
        protein_cnn_kernel,
        out_shape=jax.ShapeDtypeStruct((B, L3, CP), jnp.float32),
        in_specs=[vmem] * 5,
        out_specs=vmem,
        compiler_params=pltpu.CompilerParams(vmem_limit_bytes=64 * 1024 * 1024),
    )(tokens, w1f, w2f, w3f, prm)

    # PyTorch: v has shape (B, C3, L3); v.view(B, L3, -1) reinterprets that NCL
    # memory.  Recover exactly: drop lane padding, go to NCL, then reshape.
    v_ncl = jnp.transpose(out_p[:, :, :C3], (0, 2, 1))             # (B, C3, L3)
    return v_ncl.reshape(B, L3, C3)                                # exact .view(B, L3, -1)


if __name__ == "__main__":
    # Module config (small, consistent with ProteinCNN(embedding_dim, num_filters, kernel_size))
    embedding_dim = 16
    num_filters = [16, 32, 32]
    kernel_size = [3, 3, 3]
    B, L = 2, 16

    key = jax.random.PRNGKey(0)
    keys = jax.random.split(key, 8)

    tokens = jax.random.randint(keys[0], (B, L), 0, VOCAB, dtype=jnp.int32)

    # Embedding table, padding_idx=0 -> row 0 zeroed.
    emb = 0.1 * jax.random.normal(keys[1], (VOCAB, embedding_dim), jnp.float32)
    emb = emb.at[0].set(0.0)

    def conv_params(k, cin, cout, kw, kb):
        w = (1.0 / (cin * k) ** 0.5) * jax.random.normal(kw, (k, cin, cout), jnp.float32)
        b = 0.1 * jax.random.normal(kb, (1, cout), jnp.float32)
        gamma = jnp.ones((1, cout), jnp.float32)     # BatchNorm affine defaults
        beta = jnp.zeros((1, cout), jnp.float32)
        return (w, b, gamma, beta)

    in_ch = [embedding_dim] + num_filters
    p1 = conv_params(kernel_size[0], in_ch[0], in_ch[1], keys[2], keys[3])
    p2 = conv_params(kernel_size[1], in_ch[1], in_ch[2], keys[4], keys[5])
    p3 = conv_params(kernel_size[2], in_ch[2], in_ch[3], keys[6], keys[7])

    out = protein_cnn_forward(tokens, emb, p1, p2, p3)
    jax.block_until_ready(out)
    assert out.shape == (B, L - sum(kernel_size) + 3, num_filters[-1])
    print("KERNEL_OK")
</pallas_src>

<mosaic_0001>
module attributes {stable_mosaic.version = 11 : i64} {
  func.func @protein_cnn_kernel(%arg0: memref<2x16xi32, #tpu.memory_space<vmem>>, %arg1: memref<384x128xbf16, #tpu.memory_space<vmem>>, %arg2: memref<384x128xbf16, #tpu.memory_space<vmem>>, %arg3: memref<384x128xbf16, #tpu.memory_space<vmem>>, %arg4: memref<9x128xf32, #tpu.memory_space<vmem>>, %arg5: memref<2x10x128xf32, #tpu.memory_space<vmem>>) attributes {dimension_semantics = [], scalar_prefetch = 0 : i64, scratch_operands = 0 : i64, tpu.core_type = #tpu.core_type<tc>} {
    %c0 = arith.constant 0 : index
    %c0_0 = arith.constant 0 : index
    %0 = vector.load %arg4[%c0, %c0_0] : memref<9x128xf32, #tpu.memory_space<vmem>>, vector<9x128xf32>
    %c0_1 = arith.constant 0 : index
    %c0_2 = arith.constant 0 : index
    %1 = vector.load %arg0[%c0_1, %c0_2] : memref<2x16xi32, #tpu.memory_space<vmem>>, vector<2x16xi32>
    %2 = tpu.iota {dimensions = array<i32: 2>} : vector<2x16x128xi32>
    %3 = vector.shape_cast %1 : vector<2x16xi32> to vector<2x16x1xi32>
    %4 = vector.broadcast %3 : vector<2x16x1xi32> to vector<2x16x128xi32>
    %5 = arith.cmpi eq, %4, %2 : vector<2x16x128xi32>
    %6 = arith.extui %5 : vector<2x16x128xi1> to vector<2x16x128xi32>
    %7 = arith.sitofp %6 : vector<2x16x128xi32> to vector<2x16x128xf32>
    %8 = arith.truncf %7 : vector<2x16x128xf32> to vector<2x16x128xbf16>
    %9 = vector.extract_strided_slice %8 {offsets = [0, 0, 0], sizes = [2, 14, 128], strides = [1, 1, 1]} : vector<2x16x128xbf16> to vector<2x14x128xbf16>
    %10 = vector.extract_strided_slice %8 {offsets = [0, 1, 0], sizes = [2, 14, 128], strides = [1, 1, 1]} : vector<2x16x128xbf16> to vector<2x14x128xbf16>
    %11 = vector.extract_strided_slice %8 {offsets = [0, 2, 0], sizes = [2, 14, 128], strides = [1, 1, 1]} : vector<2x16x128xbf16> to vector<2x14x128xbf16>
    %12 = tpu.concatenate %9, %10, %11 in 2 : vector<2x14x128xbf16>, vector<2x14x128xbf16>, vector<2x14x128xbf16> -> vector<2x14x384xbf16>
    %13 = vector.shape_cast %12 : vector<2x14x384xbf16> to vector<28x384xbf16>
    %c0_3 = arith.constant 0 : index
    %c0_4 = arith.constant 0 : index
    %14 = vector.load %arg1[%c0_3, %c0_4] : memref<384x128xbf16, #tpu.memory_space<vmem>>, vector<384x128xbf16>
    %cst = arith.constant dense<0.000000e+00> : vector<28x128xf32>
    %15 = tpu.matmul %13, %14, %cst {dimension_numbers = #tpu.dot_dimension_numbers<[1], [0], [0], [1], [0, 0, 1, 1], [], []>} : vector<28x384xbf16>, vector<384x128xbf16>, vector<28x128xf32> -> vector<28x128xf32>
    %16 = vector.extract_strided_slice %0 {offsets = [0, 0], sizes = [1, 128], strides = [1, 1]} : vector<9x128xf32> to vector<1x128xf32>
    %17 = vector.extract_strided_slice %0 {offsets = [1, 0], sizes = [1, 128], strides = [1, 1]} : vector<9x128xf32> to vector<1x128xf32>
    %18 = vector.extract_strided_slice %0 {offsets = [2, 0], sizes = [1, 128], strides = [1, 1]} : vector<9x128xf32> to vector<1x128xf32>
    %19 = vector.broadcast %16 : vector<1x128xf32> to vector<28x128xf32>
    %20 = arith.addf %15, %19 : vector<28x128xf32>
    %cst_5 = arith.constant 0.000000e+00 : f32
    %21 = vector.broadcast %cst_5 : f32 to vector<28x128xf32>
    %22 = arith.maximumf %20, %21 : vector<28x128xf32>
    %cst_6 = arith.constant dense<0.000000e+00> : vector<128xf32>
    %23 = vector.multi_reduction <add>, %22, %cst_6 [0] : vector<28x128xf32> to vector<128xf32>
    %24 = vector.shape_cast %23 : vector<128xf32> to vector<1x128xf32>
    %cst_7 = arith.constant 0.0357142873 : f32
    %25 = vector.broadcast %cst_7 : f32 to vector<1x128xf32>
    %26 = arith.mulf %24, %25 : vector<1x128xf32>
    %27 = arith.mulf %22, %22 : vector<28x128xf32>
    %cst_8 = arith.constant dense<0.000000e+00> : vector<128xf32>
    %28 = vector.multi_reduction <add>, %27, %cst_8 [0] : vector<28x128xf32> to vector<128xf32>
    %29 = vector.shape_cast %28 : vector<128xf32> to vector<1x128xf32>
    %cst_9 = arith.constant 0.0357142873 : f32
    %30 = vector.broadcast %cst_9 : f32 to vector<1x128xf32>
    %31 = arith.mulf %29, %30 : vector<1x128xf32>
    %32 = arith.mulf %26, %26 : vector<1x128xf32>
    %33 = arith.subf %31, %32 : vector<1x128xf32>
    %cst_10 = arith.constant 9.99999974E-6 : f32
    %34 = vector.broadcast %cst_10 : f32 to vector<1x128xf32>
    %35 = arith.addf %33, %34 : vector<1x128xf32>
    %36 = math.rsqrt %35 : vector<1x128xf32>
    %37 = arith.mulf %17, %36 : vector<1x128xf32>
    %38 = arith.mulf %26, %37 : vector<1x128xf32>
    %39 = arith.subf %18, %38 : vector<1x128xf32>
    %40 = vector.broadcast %37 : vector<1x128xf32> to vector<28x128xf32>
    %41 = arith.mulf %22, %40 : vector<28x128xf32>
    %42 = vector.broadcast %39 : vector<1x128xf32> to vector<28x128xf32>
    %43 = arith.addf %41, %42 : vector<28x128xf32>
    %44 = vector.shape_cast %43 : vector<28x128xf32> to vector<2x14x128xf32>
    %45 = arith.truncf %44 : vector<2x14x128xf32> to vector<2x14x128xbf16>
    %46 = vector.extract_strided_slice %45 {offsets = [0, 0, 0], sizes = [2, 12, 128], strides = [1, 1, 1]} : vector<2x14x128xbf16> to vector<2x12x128xbf16>
    %47 = vector.extract_strided_slice %45 {offsets = [0, 1, 0], sizes = [2, 12, 128], strides = [1, 1, 1]} : vector<2x14x128xbf16> to vector<2x12x128xbf16>
    %48 = vector.extract_strided_slice %45 {offsets = [0, 2, 0], sizes = [2, 12, 128], strides = [1, 1, 1]} : vector<2x14x128xbf16> to vector<2x12x128xbf16>
    %49 = tpu.concatenate %46, %47, %48 in 2 : vector<2x12x128xbf16>, vector<2x12x128xbf16>, vector<2x12x128xbf16> -> vector<2x12x384xbf16>
    %50 = vector.shape_cast %49 : vector<2x12x384xbf16> to vector<24x384xbf16>
    %c0_11 = arith.constant 0 : index
    %c0_12 = arith.constant 0 : index
    %51 = vector.load %arg2[%c0_11, %c0_12] : memref<384x128xbf16, #tpu.memory_space<vmem>>, vector<384x128xbf16>
    %cst_13 = arith.constant dense<0.000000e+00> : vector<24x128xf32>
    %52 = tpu.matmul %50, %51, %cst_13 {dimension_numbers = #tpu.dot_dimension_numbers<[1], [0], [0], [1], [0, 0, 1, 1], [], []>} : vector<24x384xbf16>, vector<384x128xbf16>, vector<24x128xf32> -> vector<24x128xf32>
    %53 = vector.extract_strided_slice %0 {offsets = [3, 0], sizes = [1, 128], strides = [1, 1]} : vector<9x128xf32> to vector<1x128xf32>
    %54 = vector.extract_strided_slice %0 {offsets = [4, 0], sizes = [1, 128], strides = [1, 1]} : vector<9x128xf32> to vector<1x128xf32>
    %55 = vector.extract_strided_slice %0 {offsets = [5, 0], sizes = [1, 128], strides = [1, 1]} : vector<9x128xf32> to vector<1x128xf32>
    %56 = vector.broadcast %53 : vector<1x128xf32> to vector<24x128xf32>
    %57 = arith.addf %52, %56 : vector<24x128xf32>
    %cst_14 = arith.constant 0.000000e+00 : f32
    %58 = vector.broadcast %cst_14 : f32 to vector<24x128xf32>
    %59 = arith.maximumf %57, %58 : vector<24x128xf32>
    %cst_15 = arith.constant dense<0.000000e+00> : vector<128xf32>
    %60 = vector.multi_reduction <add>, %59, %cst_15 [0] : vector<24x128xf32> to vector<128xf32>
    %61 = vector.shape_cast %60 : vector<128xf32> to vector<1x128xf32>
    %cst_16 = arith.constant 0.0416666679 : f32
    %62 = vector.broadcast %cst_16 : f32 to vector<1x128xf32>
    %63 = arith.mulf %61, %62 : vector<1x128xf32>
    %64 = arith.mulf %59, %59 : vector<24x128xf32>
    %cst_17 = arith.constant dense<0.000000e+00> : vector<128xf32>
    %65 = vector.multi_reduction <add>, %64, %cst_17 [0] : vector<24x128xf32> to vector<128xf32>
    %66 = vector.shape_cast %65 : vector<128xf32> to vector<1x128xf32>
    %cst_18 = arith.constant 0.0416666679 : f32
    %67 = vector.broadcast %cst_18 : f32 to vector<1x128xf32>
    %68 = arith.mulf %66, %67 : vector<1x128xf32>
    %69 = arith.mulf %63, %63 : vector<1x128xf32>
    %70 = arith.subf %68, %69 : vector<1x128xf32>
    %cst_19 = arith.constant 9.99999974E-6 : f32
    %71 = vector.broadcast %cst_19 : f32 to vector<1x128xf32>
    %72 = arith.addf %70, %71 : vector<1x128xf32>
    %73 = math.rsqrt %72 : vector<1x128xf32>
    %74 = arith.mulf %54, %73 : vector<1x128xf32>
    %75 = arith.mulf %63, %74 : vector<1x128xf32>
    %76 = arith.subf %55, %75 : vector<1x128xf32>
    %77 = vector.broadcast %74 : vector<1x128xf32> to vector<24x128xf32>
    %78 = arith.mulf %59, %77 : vector<24x128xf32>
    %79 = vector.broadcast %76 : vector<1x128xf32> to vector<24x128xf32>
    %80 = arith.addf %78, %79 : vector<24x128xf32>
    %81 = vector.shape_cast %80 : vector<24x128xf32> to vector<2x12x128xf32>
    %82 = arith.truncf %81 : vector<2x12x128xf32> to vector<2x12x128xbf16>
    %83 = vector.extract_strided_slice %82 {offsets = [0, 0, 0], sizes = [2, 10, 128], strides = [1, 1, 1]} : vector<2x12x128xbf16> to vector<2x10x128xbf16>
    %84 = vector.extract_strided_slice %82 {offsets = [0, 1, 0], sizes = [2, 10, 128], strides = [1, 1, 1]} : vector<2x12x128xbf16> to vector<2x10x128xbf16>
    %85 = vector.extract_strided_slice %82 {offsets = [0, 2, 0], sizes = [2, 10, 128], strides = [1, 1, 1]} : vector<2x12x128xbf16> to vector<2x10x128xbf16>
    %86 = tpu.concatenate %83, %84, %85 in 2 : vector<2x10x128xbf16>, vector<2x10x128xbf16>, vector<2x10x128xbf16> -> vector<2x10x384xbf16>
    %87 = vector.shape_cast %86 : vector<2x10x384xbf16> to vector<20x384xbf16>
    %c0_20 = arith.constant 0 : index
    %c0_21 = arith.constant 0 : index
    %88 = vector.load %arg3[%c0_20, %c0_21] : memref<384x128xbf16, #tpu.memory_space<vmem>>, vector<384x128xbf16>
    %cst_22 = arith.constant dense<0.000000e+00> : vector<20x128xf32>
    %89 = tpu.matmul %87, %88, %cst_22 {dimension_numbers = #tpu.dot_dimension_numbers<[1], [0], [0], [1], [0, 0, 1, 1], [], []>} : vector<20x384xbf16>, vector<384x128xbf16>, vector<20x128xf32> -> vector<20x128xf32>
    %90 = vector.extract_strided_slice %0 {offsets = [6, 0], sizes = [1, 128], strides = [1, 1]} : vector<9x128xf32> to vector<1x128xf32>
    %91 = vector.extract_strided_slice %0 {offsets = [7, 0], sizes = [1, 128], strides = [1, 1]} : vector<9x128xf32> to vector<1x128xf32>
    %92 = vector.extract_strided_slice %0 {offsets = [8, 0], sizes = [1, 128], strides = [1, 1]} : vector<9x128xf32> to vector<1x128xf32>
    %93 = vector.broadcast %90 : vector<1x128xf32> to vector<20x128xf32>
    %94 = arith.addf %89, %93 : vector<20x128xf32>
    %cst_23 = arith.constant 0.000000e+00 : f32
    %95 = vector.broadcast %cst_23 : f32 to vector<20x128xf32>
    %96 = arith.maximumf %94, %95 : vector<20x128xf32>
    %cst_24 = arith.constant dense<0.000000e+00> : vector<128xf32>
    %97 = vector.multi_reduction <add>, %96, %cst_24 [0] : vector<20x128xf32> to vector<128xf32>
    %98 = vector.shape_cast %97 : vector<128xf32> to vector<1x128xf32>
    %cst_25 = arith.constant 5.000000e-02 : f32
    %99 = vector.broadcast %cst_25 : f32 to vector<1x128xf32>
    %100 = arith.mulf %98, %99 : vector<1x128xf32>
    %101 = arith.mulf %96, %96 : vector<20x128xf32>
    %cst_26 = arith.constant dense<0.000000e+00> : vector<128xf32>
    %102 = vector.multi_reduction <add>, %101, %cst_26 [0] : vector<20x128xf32> to vector<128xf32>
    %103 = vector.shape_cast %102 : vector<128xf32> to vector<1x128xf32>
    %cst_27 = arith.constant 5.000000e-02 : f32
    %104 = vector.broadcast %cst_27 : f32 to vector<1x128xf32>
    %105 = arith.mulf %103, %104 : vector<1x128xf32>
    %106 = arith.mulf %100, %100 : vector<1x128xf32>
    %107 = arith.subf %105, %106 : vector<1x128xf32>
    %cst_28 = arith.constant 9.99999974E-6 : f32
    %108 = vector.broadcast %cst_28 : f32 to vector<1x128xf32>
    %109 = arith.addf %107, %108 : vector<1x128xf32>
    %110 = math.rsqrt %109 : vector<1x128xf32>
    %111 = arith.mulf %91, %110 : vector<1x128xf32>
    %112 = arith.mulf %100, %111 : vector<1x128xf32>
    %113 = arith.subf %92, %112 : vector<1x128xf32>
    %114 = vector.broadcast %111 : vector<1x128xf32> to vector<20x128xf32>
    %115 = arith.mulf %96, %114 : vector<20x128xf32>
    %116 = vector.broadcast %113 : vector<1x128xf32> to vector<20x128xf32>
    %117 = arith.addf %115, %116 : vector<20x128xf32>
    %118 = vector.shape_cast %117 : vector<20x128xf32> to vector<2x10x128xf32>
    %c0_29 = arith.constant 0 : index
    %c0_30 = arith.constant 0 : index
    %c0_31 = arith.constant 0 : index
    %119 = vector.load %arg5[%c0_29, %c0_30, %c0_31] : memref<2x10x128xf32, #tpu.memory_space<vmem>>, vector<2x10x128xf32>
    tpu.vector_store %arg5[%c0_29, %c0_30, %c0_31], %118 {strides = array<i32>} : memref<2x10x128xf32, #tpu.memory_space<vmem>>, vector<2x10x128xf32>,
    return
  }
}

</mosaic_0001>

<bundles_post_ra>
// kernel: tpu_custom_call.1
= control target key start
LH: loop header
LB: loop body
LE: loop exit
PB: predicated region body
PF: predicated region fallthrough
CT: control target
= control target key end

     0   :  { %10 = vsyncpa [#allocation3], 0  ;;  %s2838_s0 = inlined_call_operand.hbm [shape: s32[2,16], index: 0, kind: input, shape index: {}]   ;;  %s2839_s1 = inlined_call_operand.hbm [shape: bf16[384,128], index: 1, kind: input, shape index: {}]   ;;  %s2840_s2 = inlined_call_operand.hbm [shape: bf16[384,128], index: 2, kind: input, shape index: {}]   ;;  %s2841_s3 = inlined_call_operand.hbm [shape: bf16[384,128], index: 3, kind: input, shape index: {}]   ;;  %s2842_s4 = inlined_call_operand.hbm [shape: f32[9,128], index: 4, kind: input, shape index: {}]   ;;  %s2843_s5 = inlined_call_operand.hbm [shape: f32[2,10,128], index: 5, kind: output, shape index: {}]  }
   0x1   :  { %11 = vsyncpa [#allocation6], 0 }
   0x2   :  { %12 = vsyncpa [#allocation9], 0 }
   0x3   :  { %13 = vsyncpa [#allocation4], 0  ;;  %s2573_s18 = smov [#allocation5]   ;;  %s2433_s22 = scalar_lea.hbm %s2839_s1, 3072 }
   0x4   :  { %s29_s19 = sshll.u32 %s2573_s18, 4  ;;  %p2434_p0 = scmp.ne.s32.totalorder %s2839_s1, %s2433_s22  ;;  %s30_s19 = int_to_ptr.vmem [resolvable:$true] %s29_s19 }
   0x5   :  { %p2437_p1 = scmp.lt.u32.totalorder %s2433_s22, %s2839_s1 }
   0x7   :  { %p2439_p2 = pnand %p2437_p1, %p2434_p0 }
   0x9   :  { %2442 = shalt.err (!%p2439_p2)
}
   0xa   :  { %s2443_s27 = scalar_lea.vmem %s30_s19, 3072  ;;  %p2448_p4 = scmp.lt.s32.totalorder %s30_s19, %s30_s19 }
   0xb   :  { %p2444_p3 = scmp.ne.s32.totalorder %s30_s19, %s2443_s27  ;;  %p2449_p5 = scmp.lt.s32.totalorder %s2443_s27, %s2443_s27 }
   0xd   :  { %p2450_p6 = por %p2449_p5, %p2448_p4 }
   0xf   :  { %p2451_p7 = pnand %p2450_p6, %p2444_p3 }
  0x11   :  { %2454 = shalt.err (!%p2451_p7)
}
  0x12   :  { %s2574_s28 = smov 64   ;;  %s2575_s29 = smov 4  }
  0x13   :  { %35 = dma.hbm_to_vmem [thread:$0]  %s2839_s1, 3072, %s30_s19, [#allocation6], %s2574_s28, %s2574_s28, %s2575_s29  }
  0x14   :  { %s2576_s7 = smov [#allocation8]   ;;  %s2577_s9 = smov [#allocation2]  }
  0x15   :  { %s53_s8 = sshll.u32 %s2576_s7, 4  ;;  %s20_s10 = sshll.u32 %s2577_s9, 4  ;;  %s54_s8 = int_to_ptr.vmem [resolvable:$true] %s53_s8  ;;  %s21_s10 = int_to_ptr.vmem [resolvable:$true] %s20_s10 }
  0x16   :  { %s2455_s13 = scalar_lea.hbm %s2841_s3, 3072 }
  0x17   :  { %p2456_p8 = scmp.ne.s32.totalorder %s2841_s3, %s2455_s13  ;;  %p2459_p9 = scmp.lt.u32.totalorder %s2455_s13, %s2841_s3 }
  0x19   :  { %p2461_p10 = pnand %p2459_p9, %p2456_p8 }
  0x1b   :  { %2464 = shalt.err (!%p2461_p10)
}
  0x1c   :  { %s2465_s1 = scalar_lea.vmem %s54_s8, 3072  ;;  %p2470_p12 = scmp.lt.s32.totalorder %s54_s8, %s54_s8 }
  0x1d   :  { %p2466_p11 = scmp.ne.s32.totalorder %s54_s8, %s2465_s1  ;;  %p2471_p13 = scmp.lt.s32.totalorder %s2465_s1, %s2465_s1 }
  0x1f   :  { %p2472_p0 = por %p2471_p13, %p2470_p12 }
  0x21   :  { %p2473_p1 = pnand %p2472_p0, %p2466_p11 }
  0x23   :  { %2476 = shalt.err (!%p2473_p1)
}
  0x24   :  { %59 = dma.hbm_to_vmem [thread:$0]  %s2841_s3, 3072, %s54_s8, [#allocation9], %s2574_s28, %s2574_s28, %s2575_s29  }
  0x25   :  { %s2477_s22 = scalar_lea.hbm %s2838_s0, 32 }
  0x26   :  { %p2478_p2 = scmp.ne.s32.totalorder %s2838_s0, %s2477_s22  ;;  %p2481_p3 = scmp.lt.u32.totalorder %s2477_s22, %s2838_s0 }
  0x28   :  { %p2483_p4 = pnand %p2481_p3, %p2478_p2 }
  0x2a   :  { %2486 = shalt.err (!%p2483_p4)
}
  0x2b   :  { %s2487_s27 = scalar_lea.vmem %s21_s10, 32  ;;  %p2492_p6 = scmp.lt.s32.totalorder %s21_s10, %s21_s10 }
  0x2c   :  { %p2488_p5 = scmp.ne.s32.totalorder %s21_s10, %s2487_s27  ;;  %p2493_p7 = scmp.lt.s32.totalorder %s2487_s27, %s2487_s27 }
  0x2e   :  { %p2494_p8 = por %p2493_p7, %p2492_p6 }
  0x30   :  { %p2495_p9 = pnand %p2494_p8, %p2488_p5 }
  0x32   :  { %2498 = shalt.err (!%p2495_p9)
}
  0x33   :  { %23 = dma.hbm_to_vmem [thread:$0]  %s2838_s0, 32, %s21_s10, [#allocation3]  }
  0x34   :  { %s2578_s6 = smov [#allocation7]   ;;  %s2579_s8 = smov [#allocation10]  }
  0x35   :  { %s41_s7 = sshll.u32 %s2578_s6, 4  ;;  %s65_s9 = sshll.u32 %s2579_s8, 4  ;;  %s42_s7 = int_to_ptr.vmem [resolvable:$true] %s41_s7  ;;  %s66_s9 = int_to_ptr.vmem [resolvable:$true] %s65_s9 }
  0x36   :  { %s2499_s13 = scalar_lea.hbm %s2840_s2, 3072 }
  0x37   :  { %p2500_p10 = scmp.ne.s32.totalorder %s2840_s2, %s2499_s13  ;;  %p2503_p11 = scmp.lt.u32.totalorder %s2499_s13, %s2840_s2 }
  0x39   :  { %p2505_p12 = pnand %p2503_p11, %p2500_p10 }
  0x3b   :  { %2508 = shalt.err (!%p2505_p12)
}
  0x3c   :  { %s2509_s0 = scalar_lea.vmem %s42_s7, 3072  ;;  %p2514_p0 = scmp.lt.s32.totalorder %s42_s7, %s42_s7 }
  0x3d   :  { %p2510_p13 = scmp.ne.s32.totalorder %s42_s7, %s2509_s0  ;;  %p2515_p1 = scmp.lt.s32.totalorder %s2509_s0, %s2509_s0 }
  0x3f   :  { %p2516_p2 = por %p2515_p1, %p2514_p0 }
  0x41   :  { %p2517_p3 = pnand %p2516_p2, %p2510_p13 }
  0x43   :  { %2520 = shalt.err (!%p2517_p3)
}
  0x44   :  { %47 = dma.hbm_to_vmem [thread:$0]  %s2840_s2, 3072, %s42_s7, [#allocation6], %s2574_s28, %s2574_s28, %s2575_s29  }
  0x45   :  { %s2521_s20 = scalar_lea.hbm %s2842_s4, 256 }
  0x46   :  { %p2522_p4 = scmp.ne.s32.totalorder %s2842_s4, %s2521_s20  ;;  %p2525_p5 = scmp.lt.u32.totalorder %s2521_s20, %s2842_s4 }
  0x48   :  { %p2527_p6 = pnand %p2525_p5, %p2522_p4 }
  0x4a   :  { %2530 = shalt.err (!%p2527_p6)
}
  0x4b   :  { %s2531_s25 = scalar_lea.vmem %s66_s9, 256  ;;  %p2536_p8 = scmp.lt.s32.totalorder %s66_s9, %s66_s9 }
  0x4c   :  { %p2532_p7 = scmp.ne.s32.totalorder %s66_s9, %s2531_s25  ;;  %p2537_p9 = scmp.lt.s32.totalorder %s2531_s25, %s2531_s25 }
  0x4e   :  { %p2538_p10 = por %p2537_p9, %p2536_p8 }
  0x50   :  { %p2539_p11 = pnand %p2538_p10, %p2532_p7 }
  0x52   :  { %2542 = shalt.err (!%p2539_p11)
}
  0x53   :  { %s2580_s2 = smov 128   ;;  %s2581_s28 = smov 8  }
  0x54   :  { %71 = dma.hbm_to_vmem [thread:$0]  %s2842_s4, 256, %s66_s9, [#allocation9], %s2580_s2, %s2580_s2, %s2581_s28  }
  0x55   :  { %2565 = dma.done.wait [#allocation3], 32  }
  0x56   :  { %2566 = vsyncadd [#allocation3], 4294967264 }
  0x57   :  { %2567 = dma.done.wait [#allocation6], 6144  }
  0x58   :  { %2568 = vsyncadd [#allocation6], 4294961152 }
  0x59   :  { %2569 = dma.done.wait [#allocation9], 3328  }
  0x5a   :  { %2570 = vsyncadd [#allocation9], 4294963968  ;;  %v91_v0 = vlaneseq  ;;  %v90_v4 = vld [vmem:[#allocation2] sm:$0x3]  ;;  %v2355_v7 = vld [vmem:[#allocation5 + $0x40] sm:$0xff]   ;;  %v2583_v38 = vmov 0.0  }
  0x5b   :  { %v2356_v8 = vld [vmem:[#allocation5 + $0x80] sm:$0xff]   ;;  %v2358_v10 = vld [vmem:[#allocation5 + $0x48] sm:$0xff]   ;;  %2168 = vmatprep.subr.bf16.mxu0 %v2355_v7  ;;  %v2361_v13 = vld [vmem:[#allocation5 + $0x50] sm:$0xff]   ;;  %v2582_v36 = vmov 1966171168   ;;  %vm710_vm4 = vcmask 1043456  }
  0x5c   :  { %v2689_v1 = vshrl.u32 %v91_v0, 7  ;;  %v2357_v9 = vld [vmem:[#allocation5] sm:$0xff]   ;;  %2282 = vmatprep.subr.bf16.mxu1 %v2356_v8  ;;  %v2359_v11 = vld [vmem:[#allocation5 + $0x88] sm:$0xff]   ;;  %v2362_v14 = vld [vmem:[#allocation5 + $0x90] sm:$0xff]   ;;  %v92_v31 = vand.u32 127, %v91_v0  ;;  %v151_v37 = vunpack.c.l.s4 %v2582_v36  ;;  %s2585_s4 = smov [#allocation11]  }
  0x5d   :  { %2169 = vmatpush3.bf16.msra.mxu0 %v2357_v9  ;;  %2283 = vmatpush3.bf16.msra.mxu1 %v2356_v8  ;;  %v2360_v12 = vld [vmem:[#allocation5 + $0x8] sm:$0xff]   ;;  %v2363_v15 = vld [vmem:[#allocation5 + $0x10] sm:$0xff]   ;;  %v2364_v16 = vld [vmem:[#allocation5 + $0x58] sm:$0xff]   ;;  %s2070_s27 = sshll.u32 %s2585_s4, 4  ;;  %s2071_s27 = int_to_ptr.vmem [resolvable:$true] %s2070_s27 }
  0x5e   :  { %v106_v2 = vsub.s32 1, %v2689_v1  ;;  %v2693_v3 = vsub.s32 0, %v2689_v1  ;;  %2170 = vmatprep.subr.bf16.mxu0 %v2358_v10  ;;  %2284 = vmatprep.subr.bf16.mxu1 %v2359_v11  ;;  %v2365_v17 = vld [vmem:[#allocation5 + $0x98] sm:$0xff]   ;;  %v2367_v19 = vld [vmem:[#allocation5 + $0x60] sm:$0xff]   ;;  %v2370_v22 = vld [vmem:[#allocation5 + $0x68] sm:$0xff]   ;;  %v152_v45 = vunpack.c.0.s8 %v151_v37  ;;  %s2543_s3 = scalar_lea.vmem %s2071_s27, 512  ;;  %p2548_p13 = scmp.lt.s32.totalorder %s2071_s27, %s2071_s27 }
  0x5f   :  { %v2366_v18 = vld [vmem:[#allocation5 + $0x18] sm:$0xff]   ;;  %v2368_v20 = vld [vmem:[#allocation5 + $0xa0] sm:$0xff]   ;;  %v2371_v23 = vld [vmem:[#allocation5 + $0xa8] sm:$0xff]   ;;  %p2544_p12 = scmp.ne.s32.totalorder %s2071_s27, %s2543_s3  ;;  %p2549_p0 = scmp.lt.s32.totalorder %s2543_s3, %s2543_s3 }
  0x60   :  { %v107_v5 = vrot.slane %v90_v4, %v106_v2  ;;  %v96_v6 = vrot.slane %v90_v4, %v2693_v3  ;;  %v2369_v21 = vld [vmem:[#allocation5 + $0x20] sm:$0xff]   ;;  %v2372_v24 = vld [vmem:[#allocation5 + $0x28] sm:$0xff]   ;;  %v2373_v25 = vld [vmem:[#allocation5 + $0x70] sm:$0xff]   ;;  %v2700_v54 = vsub.s32 %v152_v45, %v2689_v1 }
  0x61   :  { %2171 = vmatpush3.bf16.msra.mxu0 %v2360_v12  ;;  %2285 = vmatpush3.bf16.msra.mxu1 %v2359_v11  ;;  %v2374_v26 = vld [vmem:[#allocation5 + $0xb0] sm:$0xff]   ;;  %v2376_v28 = vld [vmem:[#allocation5 + $0x78] sm:$0xff]   ;;  %p2550_p1 = por %p2549_p0, %p2548_p13 }
  0x62   :  { %109 = vbcast.lane.b32.xlu1 %v107_v5, 256  ;;  %98 = vbcast.lane.b32.xlu0 %v96_v6, 256  ;;  %v2375_v27 = vld [vmem:[#allocation5 + $0x30] sm:$0xff]   ;;  %v2377_v29 = vld [vmem:[#allocation5 + $0xb8] sm:$0xff]  }
  0x63   :  { %2172 = vmatprep.subr.bf16.mxu0 %v2361_v13  ;;  %2286 = vmatprep.subr.bf16.mxu1 %v2362_v14  ;;  %v2378_v30 = vld [vmem:[#allocation5 + $0x38] sm:$0xff]   ;;  %p2551_p2 = pnand %p2550_p1, %p2544_p12 }
  0x65   :  { %2173 = vmatpush3.bf16.msra.mxu0 %v2363_v15  ;;  %2287 = vmatpush3.bf16.msra.mxu1 %v2362_v14 }
  0x66   :  { %113 = vbcast.lane.b32.xlu1 %v107_v5, 264  ;;  %102 = vbcast.lane.b32.xlu0 %v96_v6, 264 }
  0x67   :  { %2174 = vmatprep.subr.bf16.mxu0 %v2364_v16  ;;  %2288 = vmatprep.subr.bf16.mxu1 %v2365_v17 }
  0x69   :  { %2175 = vmatpush3.bf16.msra.mxu0 %v2366_v18  ;;  %2289 = vmatpush3.bf16.msra.mxu1 %v2365_v17 }
  0x6a   :  { %2176 = vmatprep.subr.bf16.mxu0 %v2367_v19  ;;  %2290 = vmatprep.subr.bf16.mxu1 %v2368_v20 }
  0x6d   :  { %2177 = vmatpush3.bf16.msra.mxu0 %v2369_v21  ;;  %2291 = vmatpush3.bf16.msra.mxu1 %v2368_v20 }
  0x6e   :  { %2178 = vmatprep.subr.bf16.mxu0 %v2370_v22  ;;  %2292 = vmatprep.subr.bf16.mxu1 %v2371_v23 }
  0x71   :  { %2179 = vmatpush3.bf16.msra.mxu0 %v2372_v24  ;;  %2293 = vmatpush3.bf16.msra.mxu1 %v2371_v23 }
  0x72   :  { %2180 = vmatprep.subr.bf16.mxu0 %v2373_v25  ;;  %2294 = vmatprep.subr.bf16.mxu1 %v2374_v26 }
  0x75   :  { %2181 = vmatpush3.bf16.msra.mxu0 %v2375_v27  ;;  %2295 = vmatpush3.bf16.msra.mxu1 %v2374_v26 }
  0x76   :  { %2182 = vmatprep.subr.bf16.mxu0 %v2376_v28  ;;  %2296 = vmatprep.subr.bf16.mxu1 %v2377_v29 }
  0x79   :  { %2183 = vmatpush3.bf16.msra.mxu0 %v2378_v30  ;;  %2297 = vmatpush3.bf16.msra.mxu1 %v2377_v29 }
  0xd4   :  { %v110_v32 = vpop.permute.xlu1 %109  ;;  %v99_v33 = vpop.permute.xlu0 %98 }
  0xd5   :  { %vm117_vm0 = vcmp.eq.s32.totalorder %v110_v32, %v92_v31  ;;  %vm115_vm1 = vcmp.eq.s32.totalorder %v99_v33, %v92_v31 }
  0xd6   :  { %v2086_v39 = vsel %vm117_vm0, 1.0, %v2583_v38  ;;  %v2084_v40 = vsel %vm115_vm1, 1.0, %v2583_v38 }
  0xd8   :  { %v114_v34 = vpop.permute.xlu1 %113  ;;  %v103_v35 = vpop.permute.xlu0 %102 }
  0xd9   :  { %vm118_vm2 = vcmp.eq.s32.totalorder %v114_v34, %v92_v31  ;;  %vm116_vm3 = vcmp.eq.s32.totalorder %v103_v35, %v92_v31 }
  0xda   :  { %v2087_v41 = vsel %vm118_vm2, 1.0, %v2583_v38  ;;  %v2085_v42 = vsel %vm116_vm3, 1.0, %v2583_v38 }
  0xdb   :  { %v128_v43 = vpack.c.bf16 %v2087_v41, %v2086_v39  ;;  %v127_v44 = vpack.c.bf16 %v2085_v42, %v2084_v40 }
  0xdd   :  { %v139_v46 = vshll.u32 %v128_v43, 16  ;;  %v146_v47 = vrot.slane %v128_v43, 1  ;;  %v132_v48 = vshll.u32 %v127_v44, 16  ;;  %v145_v49 = vrot.slane %v127_v44, 1 }
  0xde   :  { %v137_v50 = vshrl.u32 %v128_v43, 16  ;;  %v130_v52 = vshrl.u32 %v127_v44, 16 }
  0xdf   :  { %v141_v51 = vrot.slane %v139_v46, 1  ;;  %v134_v53 = vrot.slane %v132_v48, 1  ;;  %v215_v56 = vcombine.high %v146_v47, %v146_v47  ;;  %v149_v58 = vcombine.high %v145_v49, %v145_v49 }
  0xe0   :  { %v236_v0 = vrot.slane %v146_v47, %v2700_v54  ;;  %v170_v8 = vrot.slane %v145_v49, %v2700_v54 }
  0xe1   :  { %v142_v55 = vor.u32 %v141_v51, %v137_v50  ;;  %v135_v57 = vor.u32 %v134_v53, %v130_v52  ;;  %v243_v5 = vrot.slane %v215_v56, %v2700_v54  ;;  %v177_v9 = vrot.slane %v149_v58, %v2700_v54 }
  0xe3   :  { %v213_v59 = vcombine.low %v128_v43, %v142_v55  ;;  %v214_v60 = vcombine.high %v128_v43, %v142_v55  ;;  %v147_v61 = vcombine.low %v127_v44, %v135_v57  ;;  %v148_v62 = vcombine.high %v127_v44, %v135_v57 }
  0xe5   :  { %v222_v63 = vrot.slane %v213_v59, %v2700_v54  ;;  %v229_v4 = vrot.slane %v214_v60, %v2700_v54  ;;  %v156_v6 = vrot.slane %v147_v61, %v2700_v54  ;;  %v163_v7 = vrot.slane %v148_v62, %v2700_v54 }
  0xe7   :  { %v244_v10 = vcombine.low %v222_v63, %v236_v0  ;;  %v245_v11 = vcombine.high %v222_v63, %v236_v0  ;;  %v246_v12 = vcombine.low %v229_v4, %v243_v5  ;;  %v247_v13 = vcombine.high %v229_v4, %v243_v5  ;;  %v2379_v5 = vld [vmem:[#allocation7 + $0x80] sm:$0xff]  }
  0xe8   :  { %v178_v14 = vcombine.low %v156_v6, %v170_v8  ;;  %v179_v15 = vcombine.high %v156_v6, %v170_v8  ;;  %v180_v16 = vcombine.low %v163_v7, %v177_v9  ;;  %v181_v17 = vcombine.high %v163_v7, %v177_v9  ;;  %v2380_v6 = vld [vmem:[#allocation7 + $0x40] sm:$0xff]   ;;  %2302 = vmatprep.subr.bf16.mxu1 %v2379_v5  ;;  %v2382_v8 = vld [vmem:[#allocation7 + $0x88] sm:$0xff]  }
  0xe9   :  { %v254_v18 = vrot.slane %v244_v10, %v2700_v54  ;;  %v261_v19 = vrot.slane %v246_v12, %v2700_v54  ;;  %v268_v20 = vrot.slane %v245_v11, %v2700_v54  ;;  %v275_v26 = vrot.slane %v247_v13, %v2700_v54  ;;  %v2381_v7 = vld [vmem:[#allocation7] sm:$0xff]   ;;  %2206 = vmatprep.subr.bf16.mxu0 %v2380_v6  ;;  %v2383_v9 = vld [vmem:[#allocation7 + $0x48] sm:$0xff]   ;;  %v2385_v11 = vld [vmem:[#allocation7 + $0x90] sm:$0xff]  }
  0xea   :  { %v188_v21 = vrot.slane %v178_v14, %v2700_v54  ;;  %v195_v22 = vrot.slane %v180_v16, %v2700_v54  ;;  %v202_v23 = vrot.slane %v179_v15, %v2700_v54  ;;  %v209_v24 = vrot.slane %v181_v17, %v2700_v54  ;;  %v2384_v10 = vld [vmem:[#allocation7 + $0x8] sm:$0xff]   ;;  %v2386_v12 = vld [vmem:[#allocation7 + $0x50] sm:$0xff]   ;;  %v2388_v14 = vld [vmem:[#allocation7 + $0x98] sm:$0xff]  }
  0xeb   :  { %v276_v25 = vcombine.high %v254_v18, %v254_v18  ;;  %v277_v27 = vcombine.high %v261_v19, %v261_v19  ;;  %v278_v28 = vcombine.high %v268_v20, %v268_v20  ;;  %v2387_v13 = vld [vmem:[#allocation7 + $0x10] sm:$0xff]   ;;  %v2389_v15 = vld [vmem:[#allocation7 + $0x58] sm:$0xff]   ;;  %v2391_v17 = vld [vmem:[#allocation7 + $0xa0] sm:$0xff]  }
  0xec   :  { %v211_v29 = vcombine.high %v195_v22, %v195_v22  ;;  %v331_v30 = vcombine.low %v188_v21, %v202_v23  ;;  %v2088_v31 = vcombine.high %v188_v21, %v202_v23  ;;  %v333_v32 = vcombine.low %v195_v22, %v209_v24  ;;  %v2390_v16 = vld [vmem:[#allocation7 + $0x18] sm:$0xff]   ;;  %v2395_v21 = vld [vmem:[#allocation7 + $0x68] sm:$0xff]   ;;  %v2397_v23 = vld [vmem:[#allocation7 + $0xb0] sm:$0xff]  }
  0xed   :  { %v398_v33 = vcombine.low %v268_v20, %v276_v25  ;;  %v399_v34 = vcombine.low %v278_v28, %v261_v19  ;;  %v400_v35 = vcombine.low %v275_v26, %v277_v27  ;;  %v2393_v19 = vld [vmem:[#allocation7 + $0x20] sm:$0xff]   ;;  %v2394_v20 = vld [vmem:[#allocation7 + $0xa8] sm:$0xff]   ;;  %v2398_v24 = vld [vmem:[#allocation7 + $0x70] sm:$0xff]  }
  0xee   :  { %v334_v36 = vcombine.low %v211_v29, %v254_v18  ;;  %v341_v37 = vrot.slane %v331_v30, %v2700_v54  ;;  %v348_v38 = vrot.slane %v2088_v31, %v2700_v54  ;;  %v355_v42 = vrot.slane %v333_v32, %v2700_v54  ;;  %v2392_v18 = vld [vmem:[#allocation7 + $0x60] sm:$0xff]   ;;  %v2396_v22 = vld [vmem:[#allocation7 + $0x28] sm:$0xff]   ;;  %v2399_v25 = vld [vmem:[#allocation7 + $0x30] sm:$0xff]  }
  0xef   :  { %v407_v39 = vrot.slane %v398_v33, %v2700_v54  ;;  %v414_v40 = vrot.slane %v399_v34, %v2700_v54  ;;  %v421_v41 = vrot.slane %v400_v35, %v2700_v54  ;;  %v2400_v26 = vld [vmem:[#allocation7 + $0xb8] sm:$0xff]   ;;  %v2733_v29 = vld [vmem:[#allocation10] sm:$0xff] }
  0xf0   :  { %v362_v43 = vrot.slane %v334_v36, %v2700_v54  ;;  %v364_v44 = vcombine.high %v341_v37, %v348_v38  ;;  %v363_v45 = vcombine.low %v341_v37, %v348_v38  ;;  %v2401_v27 = vld [vmem:[#allocation7 + $0x78] sm:$0xff]   ;;  %v330_v32 = vrot.slane %v2733_v29, %v2693_v3 }
  0xf1   :  { %v422_v46 = vcombine.low %v407_v39, %v414_v40  ;;  %v423_v47 = vcombine.high %v407_v39, %v414_v40  ;;  %v424_v48 = vcombine.high %v421_v41, %v421_v41  ;;  %v445_v55 = vrot.slane %v421_v41, %v2700_v54  ;;  %v2402_v28 = vld [vmem:[#allocation7 + $0x38] sm:$0xff]  }
  0xf2   :  { %v366_v49 = vcombine.high %v355_v42, %v362_v43  ;;  %v365_v50 = vcombine.low %v355_v42, %v362_v43  ;;  %v380_v51 = vrot.slane %v364_v44, %v2700_v54  ;;  %v373_v52 = vrot.slane %v363_v45, %v2700_v54 }
  0xf3   :  { %v431_v53 = vrot.slane %v422_v46, %v2700_v54  ;;  %v438_v58 = vrot.slane %v423_v47, %v2700_v54  ;;  %v452_v59 = vrot.slane %v424_v48, %v2700_v54 }
  0xf4   :  { %v394_v56 = vrot.slane %v366_v49, %v2700_v54  ;;  %v387_v57 = vrot.slane %v365_v50, %v2700_v54 }
  0xf5   :  { %v454_v60 = vcombine.high %v431_v53, %v445_v55  ;;  %v455_v0 = vcombine.low %v438_v58, %v452_v59  ;;  %v453_v4 = vcombine.low %v431_v53, %v445_v55 }
  0xf6   :  { %v397_v61 = vcombine.low %v380_v51, %v394_v56  ;;  %v396_v62 = vcombine.high %v373_v52, %v387_v57  ;;  %v395_v63 = vcombine.low %v373_v52, %v387_v57 }
  0xf8   :  { %638 = vmatprep.mubr.bf16.mxu0 %v397_v61  ;;  %2298 = vmatprep.mubr.bf16.mxu1 %v396_v62 }
  0xf9   :  { %639 = vmatmul.mubr.bf16.vlgmr.msra.gmra.mrb[0].mxu0 %v395_v63  ;;  %2299 = vmatmul.mubr.bf16.vlgmr.msra.gmra.mrb[0].mxu1 %v454_v60 }
  0xfa   :  { %646 = vmatprep.mubr.bf16.mxu0 %v455_v0  ;;  %2303 = vmatpush3.bf16.msra.mxu1 %v2379_v5 }
  0xfb   :  { %2207 = vmatpush3.bf16.msra.mxu0 %v2381_v7  ;;  %2304 = vmatprep.subr.bf16.mxu1 %v2382_v8 }
  0xfc   :  { %2208 = vmatprep.subr.bf16.mxu0 %v2383_v9 }
  0xfe   :  { %2305 = vmatpush3.bf16.msra.mxu1 %v2382_v8 }
  0xff   :  { %2209 = vmatpush3.bf16.msra.mxu0 %v2384_v10  ;;  %2306 = vmatprep.subr.bf16.mxu1 %v2385_v11 }
 0x100   :  { %2210 = vmatprep.subr.bf16.mxu0 %v2386_v12 }
 0x101   :  { %647 = vmatmul.mubr.bf16.gmra.mrb[4].mxu0 %v453_v4 }
 0x102   :  { %2307 = vmatpush3.bf16.msra.mxu1 %v2385_v11 }
 0x103   :  { %2211 = vmatpush3.bf16.msra.mxu0 %v2387_v13  ;;  %2308 = vmatprep.subr.bf16.mxu1 %v2388_v14 }
 0x104   :  { %2212 = vmatprep.subr.bf16.mxu0 %v2389_v15 }
 0x106   :  { %2309 = vmatpush3.bf16.msra.mxu1 %v2388_v14 }
 0x107   :  { %2213 = vmatpush3.bf16.msra.mxu0 %v2390_v16  ;;  %2310 = vmatprep.subr.bf16.mxu1 %v2391_v17 }
 0x108   :  { %2214 = vmatprep.subr.bf16.mxu0 %v2392_v18 }
 0x10a   :  { %2311 = vmatpush3.bf16.msra.mxu1 %v2391_v17 }
 0x10b   :  { %2215 = vmatpush3.bf16.msra.mxu0 %v2393_v19  ;;  %2312 = vmatprep.subr.bf16.mxu1 %v2394_v20 }
 0x10c   :  { %2216 = vmatprep.subr.bf16.mxu0 %v2395_v21 }
 0x10e   :  { %2313 = vmatpush3.bf16.msra.mxu1 %v2394_v20 }
 0x10f   :  { %2217 = vmatpush3.bf16.msra.mxu0 %v2396_v22  ;;  %2314 = vmatprep.subr.bf16.mxu1 %v2397_v23 }
 0x110   :  { %2218 = vmatprep.subr.bf16.mxu0 %v2398_v24 }
 0x112   :  { %2315 = vmatpush3.bf16.msra.mxu1 %v2397_v23 }
 0x113   :  { %2219 = vmatpush3.bf16.msra.mxu0 %v2399_v25  ;;  %2316 = vmatprep.subr.bf16.mxu1 %v2400_v26 }
 0x114   :  { %2220 = vmatprep.subr.bf16.mxu0 %v2401_v27 }
 0x116   :  { %2317 = vmatpush3.bf16.msra.mxu1 %v2400_v26 }
 0x117   :  { %2221 = vmatpush3.bf16.msra.mxu0 %v2402_v28 }
 0x1cc   :  { %v2184_v30 = vpop.f32.mrb[0].mxu0  ;;  %v2300_v31 = vpop.f32.mrb[0].mxu1 }
 0x1cd   :  { %v2185_v33 = vpop.f32.mrb[1].mxu0  ;;  %v689_v34 = vpop.f32.mrb[1].mxu1 }
 0x1ce   :  { %v2186_v35 = vadd.f32 %v2185_v33, %v2184_v30  ;;  %v2187_v36 = vpop.f32.mrb[2].mxu0  ;;  %v2301_v37 = vpop.f32.mrb[2].mxu1  ;;  %v2584_v30 = vmov 1983009808  }
 0x1cf   :  { %v2188_v38 = vpop.f32.mrb[3].mxu0  ;;  %v692_v39 = vpop.f32.mrb[3].mxu1 }
 0x1d0   :  { %v641_v40 = vadd.f32 %v2186_v35, %v330_v32  ;;  %v2189_v41 = vadd.f32 %v2188_v38, %v2187_v36  ;;  %v755_v36 = vsub.s32 2, %v2689_v1 }
 0x1d2   :  { %v690_v42 = vadd.f32 %v689_v34, %v641_v40  ;;  %v644_v43 = vadd.f32 %v2189_v41, %v330_v32 }
 0x1d4   :  { %v704_v44 = vmax.f32 %v690_v42, 0.0  ;;  %v693_v45 = vadd.f32 %v692_v39, %v644_v43  ;;  %v2190_v46 = vpop.f32.mrb[4].mxu0 }
 0x1d5   :  { %v2191_v47 = vpop.f32.mrb[5].mxu0 }
 0x1d6   :  { %v705_v48 = vmax.f32 %v693_v45, 0.0  ;;  %v2192_v49 = vadd.f32 %v2191_v47, %v2190_v46  ;;  %v2193_v50 = vpop.f32.mrb[6].mxu0  ;;  %v720_v51 = vmul.f32 %v704_v44, %v704_v44 }
 0x1d7   :  { %v2194_v52 = vpop.f32.mrb[7].mxu0 }
 0x1d8   :  { %v708_v53 = vadd.f32 %v705_v48, %v704_v44  ;;  %v721_v55 = vmul.f32 %v705_v48, %v705_v48  ;;  %v649_v56 = vadd.f32 %v2192_v49, %v330_v32  ;;  %v2195_v57 = vadd.f32 %v2194_v52, %v2193_v50 }
 0x1da   :  { %v724_v58 = vadd.f32 %v721_v55, %v720_v51  ;;  %v698_v59 = vadd.f32 %v2300_v31, %v649_v56  ;;  %v652_v60 = vadd.f32 %v2195_v57, %v330_v32  ;;  %v767_v31 = vunpack.c.l.s4 %v2584_v30 }
 0x1dc   :  { %v706_v61 = vmax.f32 %v698_v59, 0.0  ;;  %v701_v62 = vadd.f32 %v2301_v37, %v652_v60  ;;  %v768_v35 = vunpack.c.0.s8 %v767_v31 }
 0x1de   :  { %v709_v63 = vadd.f32 %v708_v53, %v706_v61  ;;  %v722_v0 = vmul.f32 %v706_v61, %v706_v61  ;;  %v707_v4 = vmax.f32 %v701_v62, 0.0  ;;  %v2745_v43 = vsub.s32 %v768_v35, %v2689_v1 }
 0x1e0   :  { %v725_v5 = vadd.f32 %v724_v58, %v722_v0  ;;  %v711_v6 = vsel %vm710_vm4, %v707_v4, 0.0  ;;  %v723_v7 = vmul.f32 %v707_v4, %v707_v4 }
 0x1e1   :  { %v712_v8 = vadd.f32 %v711_v6, %v709_v63 }
 0x1e2   :  { %v726_v9 = vsel %vm710_vm4, %v723_v7, 0.0 }
 0x1e3   :  { %v713_v10 = vrot.slane %v712_v8, 4  ;;  %v727_v11 = vadd.f32 %v726_v9, %v725_v5 }
 0x1e5   :  { %v714_v12 = vadd.f32 %v713_v10, %v712_v8  ;;  %v728_v13 = vrot.slane %v727_v11, 4 }
 0x1e7   :  { %v715_v14 = vrot.slane %v714_v12, 2  ;;  %v729_v15 = vadd.f32 %v728_v13, %v727_v11 }
 0x1e9   :  { %v716_v16 = vadd.f32 %v715_v14, %v714_v12  ;;  %v730_v17 = vrot.slane %v729_v15, 2 }
 0x1eb   :  { %v717_v18 = vrot.slane %v716_v16, 1  ;;  %v731_v19 = vadd.f32 %v730_v17, %v729_v15 }
 0x1ed   :  { %v718_v20 = vadd.f32 %v717_v18, %v716_v16  ;;  %v732_v21 = vrot.slane %v731_v19, 1 }
 0x1ef   :  { %v719_v22 = vmul.f32 0.035714287, %v718_v20  ;;  %v733_v23 = vadd.f32 %v732_v21, %v731_v19 }
 0x1f1   :  { %v734_v24 = vmul.f32 0.035714287, %v733_v23  ;;  %v735_v25 = vmul.f32 %v719_v22, %v719_v22 }
 0x1f3   :  { %v736_v26 = vsub.f32 %v734_v24, %v735_v25 }
 0x1f5   :  { %v737_v27 = vadd.f32 1e-05, %v736_v26 }
 0x1f7   :  { %2427 = vrsqrt.f32 %v737_v27 }
 0x201   :  { %v2428_v28 = vpop.eup %2427 }
 0x202   :  { %v739_v32 = vmul.f32 %v2428_v28, %v2733_v29 }
 0x204   :  { %v740_v33 = vmul.f32 %v739_v32, %v719_v22  ;;  %v748_v34 = vrot.slane %v739_v32, %v106_v2 }
 0x206   :  { %v742_v37 = vrot.slane %v740_v33, 7  ;;  %v749_v38 = vmul.f32 %v748_v34, %v704_v44  ;;  %v750_v39 = vmul.f32 %v748_v34, %v705_v48  ;;  %v751_v40 = vmul.f32 %v748_v34, %v706_v61 }
 0x207   :  { %v752_v41 = vmul.f32 %v748_v34, %v707_v4 }
 0x208   :  { %v744_v42 = vsub.f32 %v2733_v29, %v742_v37 }
 0x20a   :  { %v756_v45 = vrot.slane %v744_v42, %v755_v36 }
 0x20c   :  { %v757_v46 = vadd.f32 %v756_v45, %v749_v38  ;;  %v758_v47 = vadd.f32 %v756_v45, %v750_v39  ;;  %v759_v49 = vadd.f32 %v756_v45, %v751_v40  ;;  %v760_v50 = vadd.f32 %v756_v45, %v752_v41 }
 0x20e   :  { %v765_v51 = vcombine.high %v757_v46, %v757_v46  ;;  %v772_v2 = vrot.slane %v757_v46, %v2745_v43  ;;  %v782_v52 = vcombine.high %v758_v47, %v758_v47  ;;  %v789_v53 = vrot.slane %v758_v47, %v2745_v43 }
 0x20f   :  { %v799_v44 = vcombine.high %v759_v49, %v759_v49  ;;  %v806_v48 = vrot.slane %v759_v49, %v2745_v43  ;;  %v822_v55 = vrot.slane %v760_v50, %v2745_v43 }
 0x210   :  { %v796_v56 = vrot.slane %v782_v52, %v2745_v43  ;;  %v779_v57 = vrot.slane %v765_v51, %v2745_v43  ;;  %v780_v58 = vcombine.high %v772_v2, %v772_v2  ;;  %v797_v59 = vcombine.high %v789_v53, %v789_v53 }
 0x211   :  { %v813_v60 = vrot.slane %v799_v44, %v2745_v43  ;;  %v814_v61 = vcombine.high %v806_v48, %v806_v48  ;;  %v823_v6 = vcombine.high %v822_v55, %v822_v55 }
 0x212   :  { %v798_v62 = vcombine.high %v796_v56, %v796_v56  ;;  %v781_v63 = vcombine.high %v779_v57, %v779_v57  ;;  %v824_v0 = vcombine.low %v772_v2, %v780_v58  ;;  %v841_v4 = vcombine.low %v789_v53, %v797_v59 }
 0x213   :  { %v815_v5 = vcombine.high %v813_v60, %v813_v60  ;;  %v858_v7 = vcombine.low %v814_v61, %v813_v60  ;;  %v855_v12 = vrot.slane %v796_v56, %v2745_v43  ;;  %v888_v18 = vrot.slane %v823_v6, %v2745_v43  ;;  %v2403_v6 = vld [vmem:[#allocation8 + $0x40] sm:$0xff]  }
 0x214   :  { %v857_v8 = vcombine.low %v798_v62, %v806_v48  ;;  %v825_v9 = vcombine.low %v779_v57, %v781_v63  ;;  %v848_v10 = vrot.slane %v841_v4, %v2745_v43  ;;  %v832_v15 = vrot.slane %v824_v0, %v2745_v43  ;;  %2244 = vmatprep.subr.bf16.mxu0 %v2403_v6 }
 0x215   :  { %v874_v11 = vcombine.low %v815_v5, %v822_v55  ;;  %v872_v14 = vrot.slane %v858_v7, %v2745_v43  ;;  %v2404_v7 = vld [vmem:[#allocation8 + $0x80] sm:$0xff]  }
 0x216   :  { %v865_v13 = vrot.slane %v857_v8, %v2745_v43  ;;  %v839_v16 = vrot.slane %v825_v9, %v2745_v43  ;;  %v856_v21 = vcombine.low %v848_v10, %v855_v12  ;;  %v2405_v8 = vld [vmem:[#allocation8] sm:$0xff]   ;;  %2322 = vmatprep.subr.bf16.mxu1 %v2404_v7  ;;  %v2406_v9 = vld [vmem:[#allocation8 + $0x48] sm:$0xff]   ;;  %v2409_v12 = vld [vmem:[#allocation8 + $0x50] sm:$0xff]  }
 0x217   :  { %v881_v17 = vrot.slane %v874_v11, %v2745_v43  ;;  %v2407_v10 = vld [vmem:[#allocation8 + $0x88] sm:$0xff]  }
 0x218   :  { %v873_v19 = vcombine.low %v865_v13, %v872_v14  ;;  %v840_v20 = vcombine.low %v832_v15, %v839_v16  ;;  %v2408_v11 = vld [vmem:[#allocation8 + $0x8] sm:$0xff]   ;;  %v2410_v13 = vld [vmem:[#allocation8 + $0x90] sm:$0xff]   ;;  %v2412_v15 = vld [vmem:[#allocation8 + $0x58] sm:$0xff]  }
 0x219   :  { %v889_v22 = vcombine.low %v881_v17, %v888_v18  ;;  %v2411_v14 = vld [vmem:[#allocation8 + $0x10] sm:$0xff]   ;;  %v2413_v16 = vld [vmem:[#allocation8 + $0x98] sm:$0xff]   ;;  %v2415_v18 = vld [vmem:[#allocation8 + $0x60] sm:$0xff]  }
 0x21a   :  { %v894_v23 = vpack.c.bf16 %v856_v21, %v840_v20  ;;  %v2414_v17 = vld [vmem:[#allocation8 + $0x18] sm:$0xff]   ;;  %v2417_v20 = vld [vmem:[#allocation8 + $0x20] sm:$0xff]   ;;  %v2418_v21 = vld [vmem:[#allocation8 + $0x68] sm:$0xff]  }
 0x21b   :  { %v895_v24 = vpack.c.bf16 %v889_v22, %v873_v19  ;;  %v2416_v19 = vld [vmem:[#allocation8 + $0xa0] sm:$0xff]   ;;  %v2419_v22 = vld [vmem:[#allocation8 + $0xa8] sm:$0xff]  }
 0x21c   :  { %v912_v25 = vrot.slane %v894_v23, 1  ;;  %v899_v26 = vshll.u32 %v894_v23, 16  ;;  %v897_v31 = vshrl.u32 %v894_v23, 16 }
 0x21d   :  { %v913_v27 = vrot.slane %v895_v24, 1  ;;  %v906_v28 = vshll.u32 %v895_v24, 16  ;;  %v904_v33 = vshrl.u32 %v895_v24, 16 }
 0x21e   :  { %v916_v30 = vcombine.high %v912_v25, %v912_v25  ;;  %v901_v32 = vrot.slane %v899_v26, 1  ;;  %v937_v35 = vrot.slane %v912_v25, %v2745_v43  ;;  %v2422_v25 = vld [vmem:[#allocation8 + $0xb0] sm:$0xff]  }
 0x21f   :  { %v908_v34 = vrot.slane %v906_v28, 1  ;;  %v971_v37 = vrot.slane %v913_v27, %v2745_v43  ;;  %v950_v40 = vcombine.high %v913_v27, %v913_v27  ;;  %v2423_v26 = vld [vmem:[#allocation8 + $0x30] sm:$0xff]   ;;  %v2424_v27 = vld [vmem:[#allocation8 + $0x78] sm:$0xff]  }
 0x220   :  { %v944_v36 = vrot.slane %v916_v30, %v2745_v43  ;;  %v902_v38 = vor.u32 %v901_v32, %v897_v31  ;;  %v1051_v49 = vrot.slane %v937_v35, %v2745_v43  ;;  %v2425_v28 = vld [vmem:[#allocation8 + $0xb8] sm:$0xff]   ;;  %v1032_v31 = vsub.s32 3, %v2689_v1 }
 0x221   :  { %v909_v39 = vor.u32 %v908_v34, %v904_v33  ;;  %v978_v44 = vrot.slane %v950_v40, %v2745_v43  ;;  %v2426_v30 = vld [vmem:[#allocation8 + $0x38] sm:$0xff]  }
 0x222   :  { %v2114_v41 = vcombine.low %v944_v36, %v971_v37  ;;  %v914_v42 = vcombine.low %v894_v23, %v902_v38  ;;  %v915_v45 = vcombine.high %v894_v23, %v902_v38  ;;  %v2420_v23 = vld [vmem:[#allocation8 + $0x28] sm:$0xff]   ;;  %v1033_v35 = vrot.slane %v2733_v29, %v1032_v31 }
 0x223   :  { %v948_v46 = vcombine.low %v895_v24, %v909_v39  ;;  %v949_v47 = vcombine.high %v895_v24, %v909_v39  ;;  %v2421_v24 = vld [vmem:[#allocation8 + $0x70] sm:$0xff]  }
 0x224   :  { %v1065_v50 = vrot.slane %v2114_v41, %v2745_v43  ;;  %v930_v51 = vrot.slane %v915_v45, %v2745_v43  ;;  %v923_v2 = vrot.slane %v914_v42, %v2745_v43 }
 0x225   :  { %v957_v52 = vrot.slane %v948_v46, %v2745_v43  ;;  %v964_v53 = vrot.slane %v949_v47, %v2745_v43 }
 0x226   :  { %v1068_v48 = vcombine.low %v1051_v49, %v1065_v50  ;;  %v1044_v58 = vrot.slane %v923_v2, %v2745_v43 }
 0x227   :  { %v2113_v55 = vcombine.low %v930_v51, %v957_v52  ;;  %v981_v56 = vcombine.low %v964_v53, %v978_v44  ;;  %v980_v57 = vcombine.high %v957_v52, %v971_v37 }
 0x228   :  { %2318 = vmatprep.mubr.bf16.mxu1 %v1068_v48 }
 0x229   :  { %v1058_v59 = vrot.slane %v2113_v55, %v2745_v43  ;;  %v2116_v60 = vcombine.high %v971_v37, %v981_v56  ;;  %v2115_v61 = vcombine.low %v980_v57, %v964_v53 }
 0x22b   :  { %v1066_v62 = vcombine.low %v1044_v58, %v1058_v59  ;;  %v1067_v63 = vcombine.high %v1044_v58, %v1058_v59  ;;  %v1084_v0 = vrot.slane %v2116_v60, %v2745_v43  ;;  %v1077_v4 = vrot.slane %v2115_v61, %v2745_v43 }
 0x22d   :  { %1268 = vmatprep.mubr.bf16.mxu0 %v1067_v63  ;;  %2319 = vmatmul.mubr.bf16.vlgmr.msra.gmra.mrb[4].mxu1 %v1084_v0  ;;  %v1085_v5 = vcombine.high %v1077_v4, %v1077_v4 }
 0x22e   :  { %1269 = vmatmul.mubr.bf16.vlgmr.msra.gmra.mrb[8].mxu0 %v1066_v62  ;;  %2323 = vmatpush3.bf16.msra.mxu1 %v2404_v7 }
 0x22f   :  { %1276 = vmatprep.mubr.bf16.mxu0 %v1085_v5  ;;  %2245 = vmatpush3.bf16.msra.mxu0 %v2405_v8 }
 0x230   :  { %2246 = vmatprep.subr.bf16.mxu0 %v2406_v9  ;;  %2324 = vmatprep.subr.bf16.mxu1 %v2407_v10 }
 0x232   :  { %2325 = vmatpush3.bf16.msra.mxu1 %v2407_v10 }
 0x233   :  { %2247 = vmatpush3.bf16.msra.mxu0 %v2408_v11  ;;  %2326 = vmatprep.subr.bf16.mxu1 %v2410_v13 }
 0x234   :  { %2248 = vmatprep.subr.bf16.mxu0 %v2409_v12 }
 0x236   :  { %1277 = vmatmul.mubr.bf16.gmra.mrb[12].mxu0 %v1077_v4  ;;  %2327 = vmatpush3.bf16.msra.mxu1 %v2410_v13 }
 0x237   :  { %2249 = vmatpush3.bf16.msra.mxu0 %v2411_v14  ;;  %2328 = vmatprep.subr.bf16.mxu1 %v2413_v16 }
 0x238   :  { %2250 = vmatprep.subr.bf16.mxu0 %v2412_v15 }
 0x23a   :  { %2329 = vmatpush3.bf16.msra.mxu1 %v2413_v16 }
 0x23b   :  { %2251 = vmatpush3.bf16.msra.mxu0 %v2414_v17  ;;  %2330 = vmatprep.subr.bf16.mxu1 %v2416_v19 }
 0x23c   :  { %2252 = vmatprep.subr.bf16.mxu0 %v2415_v18 }
 0x23e   :  { %2331 = vmatpush3.bf16.msra.mxu1 %v2416_v19 }
 0x23f   :  { %2253 = vmatpush3.bf16.msra.mxu0 %v2417_v20  ;;  %2332 = vmatprep.subr.bf16.mxu1 %v2419_v22 }
 0x240   :  { %2254 = vmatprep.subr.bf16.mxu0 %v2418_v21  ;;  %v1368_v21 = vsub.s32 4, %v2689_v1 }
 0x242   :  { %2333 = vmatpush3.bf16.msra.mxu1 %v2419_v22 }
 0x243   :  { %2255 = vmatpush3.bf16.msra.mxu0 %v2420_v23  ;;  %2334 = vmatprep.subr.bf16.mxu1 %v2422_v25 }
 0x244   :  { %2256 = vmatprep.subr.bf16.mxu0 %v2421_v24 }
 0x246   :  { %2335 = vmatpush3.bf16.msra.mxu1 %v2422_v25 }
 0x247   :  { %2257 = vmatpush3.bf16.msra.mxu0 %v2423_v26  ;;  %2336 = vmatprep.subr.bf16.mxu1 %v2425_v28  ;;  %v1375_v26 = vsub.s32 5, %v2689_v1 }
 0x248   :  { %2258 = vmatprep.subr.bf16.mxu0 %v2424_v27 }
 0x24a   :  { %2337 = vmatpush3.bf16.msra.mxu1 %v2425_v28 }
 0x24b   :  { %2259 = vmatpush3.bf16.msra.mxu0 %v2426_v30 }
 0x300   :  { %v2320_v32 = vpop.f32.mrb[4].mxu1 }
 0x301   :  { %v2222_v33 = vpop.f32.mrb[8].mxu0  ;;  %v1318_v34 = vpop.f32.mrb[5].mxu1 }
 0x302   :  { %v2223_v36 = vpop.f32.mrb[9].mxu0  ;;  %v2321_v37 = vpop.f32.mrb[6].mxu1 }
 0x303   :  { %v2224_v38 = vadd.f32 %v2223_v36, %v2222_v33  ;;  %v2225_v39 = vpop.f32.mrb[10].mxu0  ;;  %v1321_v40 = vpop.f32.mrb[7].mxu1 }
 0x304   :  { %v2226_v41 = vpop.f32.mrb[11].mxu0 }
 0x305   :  { %v1271_v42 = vadd.f32 %v2224_v38, %v1033_v35  ;;  %v2227_v45 = vadd.f32 %v2226_v41, %v2225_v39 }
 0x307   :  { %v1319_v46 = vadd.f32 %v1318_v34, %v1271_v42  ;;  %v1274_v47 = vadd.f32 %v2227_v45, %v1033_v35 }
 0x309   :  { %v1332_v49 = vmax.f32 %v1319_v46, 0.0  ;;  %v1322_v50 = vadd.f32 %v1321_v40, %v1274_v47  ;;  %v2228_v51 = vpop.f32.mrb[12].mxu0 }
 0x30a   :  { %v2229_v2 = vpop.f32.mrb[13].mxu0 }
 0x30b   :  { %v1333_v52 = vmax.f32 %v1322_v50, 0.0  ;;  %v2230_v53 = vadd.f32 %v2229_v2, %v2228_v51  ;;  %v2231_v44 = vpop.f32.mrb[14].mxu0  ;;  %v1344_v55 = vmul.f32 %v1332_v49, %v1332_v49 }
 0x30c   :  { %v2232_v48 = vpop.f32.mrb[15].mxu0 }
 0x30d   :  { %v1335_v56 = vadd.f32 %v1333_v52, %v1332_v49  ;;  %v1345_v57 = vmul.f32 %v1333_v52, %v1333_v52  ;;  %v1279_v58 = vadd.f32 %v2230_v53, %v1033_v35 }
 0x30f   :  { %v1347_v59 = vadd.f32 %v1345_v57, %v1344_v55  ;;  %v1327_v60 = vadd.f32 %v2320_v32, %v1279_v58 }
 0x311   :  { %v1334_v61 = vmax.f32 %v1327_v60, 0.0 }
 0x313   :  { %v1336_v62 = vadd.f32 %v1335_v56, %v1334_v61  ;;  %v1346_v63 = vmul.f32 %v1334_v61, %v1334_v61 }
 0x315   :  { %v1337_v0 = vrot.slane %v1336_v62, 4  ;;  %v1348_v4 = vadd.f32 %v1347_v59, %v1346_v63 }
 0x317   :  { %v1338_v5 = vadd.f32 %v1337_v0, %v1336_v62  ;;  %v1349_v6 = vrot.slane %v1348_v4, 4 }
 0x319   :  { %v1339_v7 = vrot.slane %v1338_v5, 2  ;;  %v1350_v8 = vadd.f32 %v1349_v6, %v1348_v4 }
 0x31b   :  { %v1340_v9 = vadd.f32 %v1339_v7, %v1338_v5  ;;  %v1351_v10 = vrot.slane %v1350_v8, 2 }
 0x31d   :  { %v1341_v11 = vrot.slane %v1340_v9, 1  ;;  %v1352_v12 = vadd.f32 %v1351_v10, %v1350_v8 }
 0x31f   :  { %v1342_v13 = vadd.f32 %v1341_v11, %v1340_v9  ;;  %v1353_v14 = vrot.slane %v1352_v12, 1 }
 0x321   :  { %v1343_v15 = vmul.f32 0.041666668, %v1342_v13  ;;  %v1354_v16 = vadd.f32 %v1353_v14, %v1352_v12 }
 0x323   :  { %v1355_v17 = vmul.f32 0.041666668, %v1354_v16  ;;  %v1356_v18 = vmul.f32 %v1343_v15, %v1343_v15 }
 0x325   :  { %v1357_v19 = vsub.f32 %v1355_v17, %v1356_v18 }
 0x327   :  { %v1358_v20 = vadd.f32 1e-05, %v1357_v19 }
 0x329   :  { %2429 = vrsqrt.f32 %v1358_v20 }
 0x333   :  { %v2430_v22 = vpop.eup %2429 }
 0x334   :  { %v1360_v23 = vmul.f32 %v2430_v22, %v2733_v29 }
 0x336   :  { %v1361_v24 = vmul.f32 %v1360_v23, %v1343_v15  ;;  %v1369_v25 = vrot.slane %v1360_v23, %v1368_v21 }
 0x338   :  { %v1363_v27 = vrot.slane %v1361_v24, 7  ;;  %v1370_v28 = vmul.f32 %v1369_v25, %v1332_v49  ;;  %v1371_v30 = vmul.f32 %v1369_v25, %v1333_v52  ;;  %v1372_v31 = vmul.f32 %v1369_v25, %v1334_v61 }
 0x33a   :  { %v1365_v32 = vsub.f32 %v2733_v29, %v1363_v27 }
 0x33c   :  { %v1376_v33 = vrot.slane %v1365_v32, %v1375_v26 }
 0x33e   :  { %v1377_v34 = vadd.f32 %v1376_v33, %v1370_v28  ;;  %v1378_v35 = vadd.f32 %v1376_v33, %v1371_v30  ;;  %v1379_v36 = vadd.f32 %v1376_v33, %v1372_v31 }
 0x340   :  { %v1383_v37 = vcombine.high %v1377_v34, %v1377_v34  ;;  %v1384_v38 = vcombine.high %v1378_v35, %v1378_v35  ;;  %v1385_v39 = vcombine.high %v1379_v36, %v1379_v36 }
 0x342   :  { %v1387_v40 = vcombine.low %v1377_v34, %v1383_v37  ;;  %v1388_v41 = vcombine.low %v1384_v38, %v1379_v36 }
 0x344   :  { %v1391_v42 = vpack.c.bf16 %v1378_v35, %v1387_v40  ;;  %v1392_v45 = vpack.c.bf16 %v1385_v39, %v1388_v41 }
 0x346   :  { %v1396_v46 = vshll.u32 %v1391_v42, 16  ;;  %v1403_v47 = vshll.u32 %v1392_v45, 16  ;;  %v1409_v50 = vrot.slane %v1391_v42, 1  ;;  %v1410_v51 = vrot.slane %v1392_v45, 1 }
 0x347   :  { %v1394_v49 = vshrl.u32 %v1391_v42, 16  ;;  %v1401_v52 = vshrl.u32 %v1392_v45, 16 }
 0x348   :  { %v1398_v2 = vrot.slane %v1396_v46, 1  ;;  %v1405_v53 = vrot.slane %v1403_v47, 1  ;;  %v1413_v44 = vcombine.high %v1409_v50, %v1409_v50  ;;  %v1470_v56 = vcombine.high %v1410_v51, %v1410_v51 }
 0x349   :  { %v1434_v61 = vrot.slane %v1409_v50, %v2700_v54  ;;  %v1491_v63 = vrot.slane %v1410_v51, %v2700_v54 }
 0x34a   :  { %v1399_v48 = vor.u32 %v1398_v2, %v1394_v49  ;;  %v1406_v55 = vor.u32 %v1405_v53, %v1401_v52  ;;  %v1441_v62 = vrot.slane %v1413_v44, %v2700_v54  ;;  %v1498_v7 = vrot.slane %v1470_v56, %v2700_v54 }
 0x34b   :  { %v1575_v49 = vsub.s32 6, %v2689_v1 }
 0x34c   :  { %v1411_v57 = vcombine.low %v1391_v42, %v1399_v48  ;;  %v1412_v58 = vcombine.high %v1391_v42, %v1399_v48  ;;  %v1468_v59 = vcombine.low %v1392_v45, %v1406_v55  ;;  %v1469_v60 = vcombine.high %v1392_v45, %v1406_v55 }
 0x34d   :  { %v1576_v53 = vrot.slane %v2733_v29, %v1575_v49 }
 0x34e   :  { %v1420_v0 = vrot.slane %v1411_v57, %v2700_v54  ;;  %v1427_v4 = vrot.slane %v1412_v58, %v2700_v54  ;;  %v1477_v5 = vrot.slane %v1468_v59, %v2700_v54  ;;  %v1484_v6 = vrot.slane %v1469_v60, %v2700_v54 }
 0x350   :  { %v1442_v8 = vcombine.low %v1420_v0, %v1434_v61  ;;  %v1443_v9 = vcombine.high %v1420_v0, %v1434_v61  ;;  %v1444_v10 = vcombine.low %v1427_v4, %v1441_v62  ;;  %v1499_v11 = vcombine.low %v1477_v5, %v1491_v63 }
 0x351   :  { %v1500_v12 = vcombine.high %v1477_v5, %v1491_v63  ;;  %v1501_v13 = vcombine.low %v1484_v6, %v1498_v7 }
 0x352   :  { %v1451_v14 = vrot.slane %v1442_v8, %v2700_v54  ;;  %v1458_v15 = vrot.slane %v1444_v10, %v2700_v54  ;;  %v1465_v16 = vrot.slane %v1443_v9, %v2700_v54  ;;  %v1508_v17 = vrot.slane %v1499_v11, %v2700_v54 }
 0x353   :  { %v1522_v18 = vrot.slane %v1500_v12, %v2700_v54  ;;  %v1515_v23 = vrot.slane %v1501_v13, %v2700_v54 }
 0x354   :  { %v1523_v19 = vcombine.high %v1508_v17, %v1508_v17  ;;  %v1577_v20 = vcombine.low %v1451_v14, %v1465_v16  ;;  %v2141_v21 = vcombine.high %v1451_v14, %v1465_v16  ;;  %v1579_v22 = vcombine.low %v1458_v15, %v1508_v17 }
 0x355   :  { %v1524_v24 = vcombine.high %v1522_v18, %v1522_v18 }
 0x356   :  { %v1580_v25 = vcombine.low %v1522_v18, %v1523_v19  ;;  %v1587_v26 = vrot.slane %v1577_v20, %v2700_v54  ;;  %v1594_v27 = vrot.slane %v2141_v21, %v2700_v54  ;;  %v1601_v30 = vrot.slane %v1579_v22, %v2700_v54 }
 0x357   :  { %v1644_v28 = vcombine.low %v1524_v24, %v1515_v23 }
 0x358   :  { %v1608_v31 = vrot.slane %v1580_v25, %v2700_v54  ;;  %v1610_v32 = vcombine.high %v1587_v26, %v1594_v27  ;;  %v1609_v33 = vcombine.low %v1587_v26, %v1594_v27 }
 0x359   :  { %v1651_v34 = vrot.slane %v1644_v28, %v2700_v54 }
 0x35a   :  { %v1612_v35 = vcombine.high %v1601_v30, %v1608_v31  ;;  %v1611_v36 = vcombine.low %v1601_v30, %v1608_v31  ;;  %v1626_v37 = vrot.slane %v1610_v32, %v2700_v54  ;;  %v1619_v40 = vrot.slane %v1609_v33, %v2700_v54 }
 0x35b   :  { %v1659_v38 = vrot.slane %v1651_v34, %v2700_v54  ;;  %v1652_v42 = vcombine.high %v1651_v34, %v1651_v34 }
 0x35c   :  { %v1640_v39 = vrot.slane %v1612_v35, %v2700_v54  ;;  %v1633_v41 = vrot.slane %v1611_v36, %v2700_v54 }
 0x35d   :  { %v1667_v50 = vcombine.high %v1659_v38, %v1659_v38  ;;  %v1666_v51 = vrot.slane %v1652_v42, %v2700_v54 }
 0x35e   :  { %v1643_v45 = vcombine.low %v1626_v37, %v1640_v39  ;;  %v1641_v46 = vcombine.low %v1619_v40, %v1633_v41  ;;  %v1642_v47 = vcombine.high %v1619_v40, %v1633_v41  ;;  %v1952_v40 = vsub.s32 7, %v2689_v1 }
 0x360   :  { %1850 = vmatprep.mubr.bf16.mxu0 %v1643_v45  ;;  %2338 = vmatprep.mubr.bf16.mxu1 %v1642_v47  ;;  %v89_v47 = vld [vmem:[#allocation10 + $0x8] sm:$0x1] }
 0x361   :  { %1851 = vmatmul.mubr.bf16.vlgmr.msra.gmra.mrb[16].mxu0 %v1641_v46  ;;  %2339 = vmatmul.mubr.bf16.vlgmr.msra.gmra.mrb[8].mxu1 %v1667_v50 }
 0x362   :  { %1858 = vmatprep.mubr.bf16.mxu0 %v1666_v51 }
 0x369   :  { %1859 = vmatmul.mubr.bf16.gmra.mrb[20].mxu0 %v1659_v38 }
 0x434   :  { %v2260_v2 = vpop.f32.mrb[16].mxu0  ;;  %v2340_v52 = vpop.f32.mrb[8].mxu1 }
 0x435   :  { %v2261_v44 = vpop.f32.mrb[17].mxu0  ;;  %v1900_v48 = vpop.f32.mrb[9].mxu1 }
 0x436   :  { %v2262_v55 = vadd.f32 %v2261_v44, %v2260_v2  ;;  %v2263_v56 = vpop.f32.mrb[18].mxu0  ;;  %v2341_v57 = vpop.f32.mrb[10].mxu1 }
 0x437   :  { %v2264_v58 = vpop.f32.mrb[19].mxu0  ;;  %v1903_v59 = vpop.f32.mrb[11].mxu1 }
 0x438   :  { %v1853_v60 = vadd.f32 %v2262_v55, %v1576_v53  ;;  %v2265_v61 = vadd.f32 %v2264_v58, %v2263_v56 }
 0x43a   :  { %v1901_v54 = vadd.f32 %v1900_v48, %v1853_v60  ;;  %v1856_v62 = vadd.f32 %v2265_v61, %v1576_v53 }
 0x43c   :  { %v1914_v63 = vmax.f32 %v1901_v54, 0.0  ;;  %v1904_v0 = vadd.f32 %v1903_v59, %v1856_v62  ;;  %v2266_v4 = vpop.f32.mrb[20].mxu0 }
 0x43d   :  { %v2267_v5 = vpop.f32.mrb[21].mxu0 }
 0x43e   :  { %v1915_v6 = vmax.f32 %v1904_v0, 0.0  ;;  %v2268_v7 = vadd.f32 %v2267_v5, %v2266_v4  ;;  %v2269_v8 = vpop.f32.mrb[22].mxu0  ;;  %v1927_v10 = vmul.f32 %v1914_v63, %v1914_v63 }
 0x43f   :  { %v2270_v9 = vpop.f32.mrb[23].mxu0 }
 0x440   :  { %v1917_v11 = vadd.f32 %v1915_v6, %v1914_v63  ;;  %v1928_v12 = vmul.f32 %v1915_v6, %v1915_v6  ;;  %v1861_v13 = vadd.f32 %v2268_v7, %v1576_v53 }
 0x442   :  { %v1930_v14 = vadd.f32 %v1928_v12, %v1927_v10  ;;  %v1909_v15 = vadd.f32 %v2340_v52, %v1861_v13 }
 0x444   :  { %v1916_v16 = vmax.f32 %v1909_v15, 0.0 }
 0x446   :  { %v1918_v17 = vsel %vm710_vm4, %v1916_v16, 0.0  ;;  %v1929_v18 = vmul.f32 %v1916_v16, %v1916_v16 }
 0x447   :  { %v1919_v19 = vadd.f32 %v1918_v17, %v1917_v11 }
 0x448   :  { %v1931_v20 = vsel %vm710_vm4, %v1929_v18, 0.0 }
 0x449   :  { %v1920_v21 = vrot.slane %v1919_v19, 4  ;;  %v1932_v22 = vadd.f32 %v1931_v20, %v1930_v14 }
 0x44b   :  { %v1921_v23 = vadd.f32 %v1920_v21, %v1919_v19  ;;  %v1933_v24 = vrot.slane %v1932_v22, 4 }
 0x44d   :  { %v1922_v25 = vrot.slane %v1921_v23, 2  ;;  %v1934_v26 = vadd.f32 %v1933_v24, %v1932_v22 }
 0x44f   :  { %v1923_v27 = vadd.f32 %v1922_v25, %v1921_v23  ;;  %v1935_v28 = vrot.slane %v1934_v26, 2 }
 0x451   :  { %v1924_v30 = vrot.slane %v1923_v27, 1  ;;  %v1936_v31 = vadd.f32 %v1935_v28, %v1934_v26 }
 0x453   :  { %v1925_v32 = vadd.f32 %v1924_v30, %v1923_v27  ;;  %v1937_v33 = vrot.slane %v1936_v31, 1 }
 0x455   :  { %v1926_v34 = vmul.f32 0.05, %v1925_v32  ;;  %v1938_v35 = vadd.f32 %v1937_v33, %v1936_v31 }
 0x457   :  { %v1939_v36 = vmul.f32 0.05, %v1938_v35  ;;  %v1940_v37 = vmul.f32 %v1926_v34, %v1926_v34 }
 0x459   :  { %v1941_v38 = vsub.f32 %v1939_v36, %v1940_v37 }
 0x45b   :  { %v1942_v39 = vadd.f32 1e-05, %v1941_v38 }
 0x45d   :  { %2431 = vrsqrt.f32 %v1942_v39 }
 0x467   :  { %v2432_v41 = vpop.eup %2431 }
 0x468   :  { %v1944_v42 = vmul.f32 %v2432_v41, %v2733_v29 }
 0x46a   :  { %v1945_v45 = vmul.f32 %v1944_v42, %v1926_v34  ;;  %v1953_v46 = vrot.slane %v1944_v42, %v1952_v40 }
 0x46c   :  { %v1947_v50 = vrot.slane %v1945_v45, 7  ;;  %v1954_v51 = vmul.f32 %v1953_v46, %v1914_v63  ;;  %v1956_v49 = vmul.f32 %v1953_v46, %v1916_v16  ;;  %v1955_v2 = vmul.f32 %v1953_v46, %v1915_v6 }
 0x46e   :  { %v1949_v52 = vsub.f32 %v89_v47, %v1947_v50 }
 0x470   :  { %v1960_v53 = vrot.slane %v1949_v52, %v2693_v3 }
 0x472   :  { %v1963_v44 = vadd.f32 %v1960_v53, %v1956_v49  ;;  %v1961_v48 = vadd.f32 %v1960_v53, %v1954_v51  ;;  %v1962_v55 = vadd.f32 %v1960_v53, %v1955_v2 }
 0x474   :  { %v1967_v56 = vcombine.high %v1961_v48, %v1961_v48  ;;  %v1974_v57 = vrot.slane %v1961_v48, %v2745_v43  ;;  %v1984_v1 = vcombine.high %v1962_v55, %v1962_v55  ;;  %v1991_v58 = vrot.slane %v1962_v55, %v2745_v43 }
 0x475   :  { %v2007_v29 = vrot.slane %v1963_v44, %v2745_v43 }
 0x476   :  { %v1981_v59 = vrot.slane %v1967_v56, %v2745_v43  ;;  %v1982_v60 = vcombine.high %v1974_v57, %v1974_v57  ;;  %v1998_v61 = vrot.slane %v1984_v1, %v2745_v43  ;;  %v1999_v54 = vcombine.high %v1991_v58, %v1991_v58  ;;  %2166 = vst.sshfl [vmem:[#allocation11 + $0x8] sm:$0x3 pattern:$0x76325410] %v1991_v58 }
 0x477   :  { %v2008_v62 = vcombine.high %v2007_v29, %v2007_v29 }
 0x478   :  { %v1983_v3 = vcombine.high %v1981_v59, %v1981_v59  ;;  %v2000_v63 = vcombine.high %v1998_v61, %v1998_v61  ;;  %v2009_v0 = vcombine.low %v1974_v57, %v1982_v60  ;;  %v2033_v4 = vcombine.low %v1999_v54, %v1998_v61 }
 0x479   :  { %2167 = vst.sshfl [vmem:[#allocation11 + $0x18] sm:$0x3 pattern:$0x76325410] %v2008_v62 }
 0x47a   :  { %v2010_v5 = vcombine.low %v1981_v59, %v1983_v3  ;;  %v2034_v6 = vcombine.low %v2000_v63, %v2007_v29  ;;  %v2017_v7 = vrot.slane %v2009_v0, %v2745_v43  ;;  %v2041_v9 = vrot.slane %v2033_v4, %v2745_v43 }
 0x47c   :  { %v2024_v8 = vrot.slane %v2010_v5, %v2745_v43  ;;  %v2048_v10 = vrot.slane %v2034_v6, %v2745_v43 }
 0x47e   :  { %v2025_v11 = vcombine.low %v2017_v7, %v2024_v8  ;;  %v2049_v12 = vcombine.low %v2041_v9, %v2048_v10 }
 0x480   :  { %2061 = vst [vmem:[#allocation11] sm:$0xff] %v2025_v11  ;;  %2063 = vst [vmem:[#allocation11 + $0x10] sm:$0xff] %v2049_v12 }
 0x481   :  { %2554 = shalt.err (!%p2551_p2)
}
 0x482   :  { %s2555_s7 = scalar_lea.hbm %s2843_s5, 512 }
 0x483   :  { %p2556_p3 = scmp.ne.s32.totalorder %s2843_s5, %s2555_s7  ;;  %p2559_p4 = scmp.lt.u32.totalorder %s2555_s7, %s2843_s5 }
 0x485   :  { %p2561_p5 = pnand %p2559_p4, %p2556_p3 }
 0x487   :  { %2564 = shalt.err (!%p2561_p5)
}
 0x488   :  { %2076 = dma.vmem_to_hbm [thread:$0]  %s2071_s27, 512, %s2843_s5, [#allocation4], %s2580_s2, %s2580_s2, %s2581_s28  }
 0x489   :  { %2571 = dma.done.wait [#allocation4], 512  }
 0x48a   :  { %2572 = vsyncadd [#allocation4], 4294966784 }
 0x48b   :  { %2080 = vsyncpa [#allocation3], 1 }
 0x48c   :  { %2081 = vsyncpa [#allocation6], 1 }
 0x48d   :  { %2082 = vsyncpa [#allocation9], 1 }
 0x48e   :  { %2083 = vsyncpa [#allocation4], 1 }

</bundles_post_ra>
